<compile_context>
chip_gen: v6e
topology: v6e:2x2x1
jax: 0.10.0
libtpu: 0.0.40
codegen_flags: <defaults>
</compile_context>

<pallas_src>
import functools

import jax
import jax.numpy as jnp
from jax.experimental import pallas as pl
from jax.experimental.pallas import tpu as pltpu

_LANE = 128
_SUBLANE = 8


def _round_up(n, m):
    return ((n + m - 1) // m) * m


def _ae_kernel(x_ref, w_ref, b_ref, out_ref, *, n_layers, relu_skip):
    # x_ref: (TB, D) f32; w_ref: (n_layers, D, D) bf16; b_ref: (n_layers, 1, D) f32
    h = x_ref[...].astype(jnp.float32)
    for l in range(n_layers):                      # unrolled at trace time
        y = jnp.dot(h.astype(jnp.bfloat16), w_ref[l],
                    preferred_element_type=jnp.float32)   # MXU, f32 acc
        y = y + b_ref[l]                                    # VPU, f32, (1, D) bcast
        if l not in relu_skip:
            y = jnp.maximum(y, 0.0)
        h = y
    out_ref[...] = h.astype(out_ref.dtype)


def ae_forward(x, params, *, block_rows=512):
    """x: [B, inp_dim] f32.  params: list of (W_t (in,out), b (out,)) in forward
    order enc.fc1..fc4, dec.fc1..fc4.  Returns [B, inp_dim] f32."""
    B, inp_dim = x.shape
    n_layers = len(params)

    dims = {inp_dim}
    for w_t, _ in params:
        dims.add(w_t.shape[0])
        dims.add(w_t.shape[1])
    D = _round_up(max(dims), _LANE)               # lane-dense padded feature dim

    # Stack every layer into one padded weight slab and one bias slab.
    w_stack = jnp.zeros((n_layers, D, D), jnp.float32)
    b_stack = jnp.zeros((n_layers, 1, D), jnp.float32)
    for l, (w_t, b) in enumerate(params):
        fi, fo = w_t.shape
        w_stack = w_stack.at[l, :fi, :fo].set(w_t)
        b_stack = b_stack.at[l, 0, :fo].set(b)
    w_stack = w_stack.astype(jnp.bfloat16)        # bf16 MXU inputs

    # Batch tiling: big tiles (<=block_rows rows) bounded by VMEM; pad B up.
    TB = min(block_rows, _round_up(B, _SUBLANE))
    Bp = _round_up(B, TB)
    x_pad = jnp.zeros((Bp, D), jnp.float32).at[:B, :inp_dim].set(x)

    grid = (Bp // TB,)

    flops = 2 * B * sum(w.shape[0] * w.shape[1] for w, _ in params)
    bytes_accessed = (x_pad.size * 4 + w_stack.size * 2 + b_stack.size * 4
                      + Bp * D * 4)

    out = pl.pallas_call(
        functools.partial(_ae_kernel, n_layers=n_layers, relu_skip=(3, 7)),
        out_shape=jax.ShapeDtypeStruct((Bp, D), jnp.float32),
        grid=grid,
        in_specs=[
            pl.BlockSpec((TB, D), lambda i: (i, 0)),                  # batch tile
            pl.BlockSpec((n_layers, D, D), lambda i: (0, 0, 0)),      # weights, resident
            pl.BlockSpec((n_layers, 1, D), lambda i: (0, 0, 0)),      # biases, resident
        ],
        out_specs=pl.BlockSpec((TB, D), lambda i: (i, 0)),
        compiler_params=pltpu.CompilerParams(
            dimension_semantics=("parallel",),
        ),
        cost_estimate=pl.CostEstimate(
            flops=flops, transcendentals=0, bytes_accessed=bytes_accessed),
    )(x_pad, w_stack, b_stack)

    return out[:B, :inp_dim]


def init_params(key, inp_dim, enc_dim, latent_dim):
    """Deterministic init matching PyTorch nn.Linear shapes.  Returns list of
    (W_transposed (in,out), b (out,)) for enc.fc1..fc4, dec.fc1..fc4."""
    layer_dims = [
        (inp_dim, enc_dim), (enc_dim, enc_dim), (enc_dim, enc_dim), (enc_dim, latent_dim),
        (latent_dim, enc_dim), (enc_dim, enc_dim), (enc_dim, enc_dim), (enc_dim, inp_dim),
    ]
    params = []
    for fan_in, fan_out in layer_dims:
        key, kw, kb = jax.random.split(key, 3)
        bound = 1.0 / jnp.sqrt(fan_in)
        w_t = jax.random.uniform(kw, (fan_in, fan_out), jnp.float32, -bound, bound)
        b = jax.random.uniform(kb, (fan_out,), jnp.float32, -bound, bound)
        params.append((w_t, b))
    return params


def ae_reference_f32(x, params):
    h = x
    for i, (w_t, b) in enumerate(params):
        h = h @ w_t + b
        if i not in (3, 7):   # no ReLU after enc.fc4 and dec.fc4
            h = jnp.maximum(h, 0.0)
    return h


def ae_reference_bf16(x, params):
    """Matches kernel numerics: bf16 matmul inputs, f32 accumulation,
    bias add / ReLU in f32."""
    h = x.astype(jnp.float32)
    for i, (w_t, b) in enumerate(params):
        h = jnp.dot(h.astype(jnp.bfloat16), w_t.astype(jnp.bfloat16),
                    preferred_element_type=jnp.float32) + b
        if i not in (3, 7):
            h = jnp.maximum(h, 0.0)
    return h


if __name__ == "__main__":
    inp_dim, enc_dim, latent_dim = 32, 32, 8
    batch = 64

    key = jax.random.PRNGKey(0)
    key, kx = jax.random.split(key)
    x = jax.random.normal(kx, (batch, inp_dim), jnp.float32)
    params = init_params(key, inp_dim, enc_dim, latent_dim)

    out = jax.block_until_ready(ae_forward(x, params))

    ref_match = ae_reference_bf16(x, params)   # same casting as the kernel
    ref_f32 = ae_reference_f32(x, params)      # full-precision sanity check

    assert out.shape == (batch, inp_dim)
    assert jnp.allclose(out, ref_match, atol=2e-3, rtol=2e-3), \
        float(jnp.max(jnp.abs(out - ref_match)))
    assert jnp.allclose(out, ref_f32, atol=5e-2, rtol=5e-2), \
        float(jnp.max(jnp.abs(out - ref_f32)))
    print("KERNEL_OK")
</pallas_src>

<mosaic_0001>
module attributes {stable_mosaic.version = 11 : i64} {
  func.func @_ae_kernel(%arg0: i32, %arg1: memref<64x128xf32, #tpu.memory_space<vmem>>, %arg2: memref<8x128x128xbf16, #tpu.memory_space<vmem>>, %arg3: memref<8x1x128xf32, #tpu.memory_space<vmem>>, %arg4: memref<64x128xf32, #tpu.memory_space<vmem>>) attributes {dimension_semantics = [#tpu.dimension_semantics<parallel>], iteration_bounds = array<i64: 1>, scalar_prefetch = 0 : i64, scratch_operands = 0 : i64, tpu.core_type = #tpu.core_type<tc>, window_params = [{transform_indices = @transform_0, window_bounds = array<i64: 64, 128>}, {pipeline_mode = #tpu.pipeline_mode<synchronous>, transform_indices = @transform_1, window_bounds = array<i64: 8, 128, 128>}, {pipeline_mode = #tpu.pipeline_mode<synchronous>, transform_indices = @transform_2, window_bounds = array<i64: 8, 1, 128>}, {transform_indices = @transform_3, window_bounds = array<i64: 64, 128>}]} {
    %c0 = arith.constant 0 : index
    %c0_0 = arith.constant 0 : index
    %0 = vector.load %arg1[%c0, %c0_0] : memref<64x128xf32, #tpu.memory_space<vmem>>, vector<64x128xf32>
    %1 = arith.truncf %0 : vector<64x128xf32> to vector<64x128xbf16>
    %c0_1 = arith.constant 0 : index
    %c0_2 = arith.constant 0 : index
    %c0_3 = arith.constant 0 : index
    %2 = vector.load %arg2[%c0_1, %c0_2, %c0_3] : memref<8x128x128xbf16, #tpu.memory_space<vmem>>, vector<1x128x128xbf16>
    %3 = vector.shape_cast %2 : vector<1x128x128xbf16> to vector<128x128xbf16>
    %cst = arith.constant dense<0.000000e+00> : vector<64x128xf32>
    %4 = tpu.matmul %1, %3, %cst {dimension_numbers = #tpu.dot_dimension_numbers<[1], [0], [0], [1], [0, 0, 1, 1], [], []>} : vector<64x128xbf16>, vector<128x128xbf16>, vector<64x128xf32> -> vector<64x128xf32>
    %c0_4 = arith.constant 0 : index
    %c0_5 = arith.constant 0 : index
    %c0_6 = arith.constant 0 : index
    %5 = vector.load %arg3[%c0_4, %c0_5, %c0_6] : memref<8x1x128xf32, #tpu.memory_space<vmem>>, vector<1x1x128xf32>
    %6 = vector.shape_cast %5 : vector<1x1x128xf32> to vector<1x128xf32>
    %7 = vector.broadcast %6 : vector<1x128xf32> to vector<64x128xf32>
    %8 = arith.addf %4, %7 : vector<64x128xf32>
    %cst_7 = arith.constant 0.000000e+00 : f32
    %9 = vector.broadcast %cst_7 : f32 to vector<64x128xf32>
    %10 = arith.maximumf %8, %9 : vector<64x128xf32>
    %11 = arith.truncf %10 : vector<64x128xf32> to vector<64x128xbf16>
    %c1 = arith.constant 1 : index
    %c0_8 = arith.constant 0 : index
    %c0_9 = arith.constant 0 : index
    %12 = vector.load %arg2[%c1, %c0_8, %c0_9] : memref<8x128x128xbf16, #tpu.memory_space<vmem>>, vector<1x128x128xbf16>
    %13 = vector.shape_cast %12 : vector<1x128x128xbf16> to vector<128x128xbf16>
    %cst_10 = arith.constant dense<0.000000e+00> : vector<64x128xf32>
    %14 = tpu.matmul %11, %13, %cst_10 {dimension_numbers = #tpu.dot_dimension_numbers<[1], [0], [0], [1], [0, 0, 1, 1], [], []>} : vector<64x128xbf16>, vector<128x128xbf16>, vector<64x128xf32> -> vector<64x128xf32>
    %c1_11 = arith.constant 1 : index
    %c0_12 = arith.constant 0 : index
    %c0_13 = arith.constant 0 : index
    %15 = vector.load %arg3[%c1_11, %c0_12, %c0_13] : memref<8x1x128xf32, #tpu.memory_space<vmem>>, vector<1x1x128xf32>
    %16 = vector.shape_cast %15 : vector<1x1x128xf32> to vector<1x128xf32>
    %17 = vector.broadcast %16 : vector<1x128xf32> to vector<64x128xf32>
    %18 = arith.addf %14, %17 : vector<64x128xf32>
    %cst_14 = arith.constant 0.000000e+00 : f32
    %19 = vector.broadcast %cst_14 : f32 to vector<64x128xf32>
    %20 = arith.maximumf %18, %19 : vector<64x128xf32>
    %21 = arith.truncf %20 : vector<64x128xf32> to vector<64x128xbf16>
    %c2 = arith.constant 2 : index
    %c0_15 = arith.constant 0 : index
    %c0_16 = arith.constant 0 : index
    %22 = vector.load %arg2[%c2, %c0_15, %c0_16] : memref<8x128x128xbf16, #tpu.memory_space<vmem>>, vector<1x128x128xbf16>
    %23 = vector.shape_cast %22 : vector<1x128x128xbf16> to vector<128x128xbf16>
    %cst_17 = arith.constant dense<0.000000e+00> : vector<64x128xf32>
    %24 = tpu.matmul %21, %23, %cst_17 {dimension_numbers = #tpu.dot_dimension_numbers<[1], [0], [0], [1], [0, 0, 1, 1], [], []>} : vector<64x128xbf16>, vector<128x128xbf16>, vector<64x128xf32> -> vector<64x128xf32>
    %c2_18 = arith.constant 2 : index
    %c0_19 = arith.constant 0 : index
    %c0_20 = arith.constant 0 : index
    %25 = vector.load %arg3[%c2_18, %c0_19, %c0_20] : memref<8x1x128xf32, #tpu.memory_space<vmem>>, vector<1x1x128xf32>
    %26 = vector.shape_cast %25 : vector<1x1x128xf32> to vector<1x128xf32>
    %27 = vector.broadcast %26 : vector<1x128xf32> to vector<64x128xf32>
    %28 = arith.addf %24, %27 : vector<64x128xf32>
    %cst_21 = arith.constant 0.000000e+00 : f32
    %29 = vector.broadcast %cst_21 : f32 to vector<64x128xf32>
    %30 = arith.maximumf %28, %29 : vector<64x128xf32>
    %31 = arith.truncf %30 : vector<64x128xf32> to vector<64x128xbf16>
    %c3 = arith.constant 3 : index
    %c0_22 = arith.constant 0 : index
    %c0_23 = arith.constant 0 : index
    %32 = vector.load %arg2[%c3, %c0_22, %c0_23] : memref<8x128x128xbf16, #tpu.memory_space<vmem>>, vector<1x128x128xbf16>
    %33 = vector.shape_cast %32 : vector<1x128x128xbf16> to vector<128x128xbf16>
    %cst_24 = arith.constant dense<0.000000e+00> : vector<64x128xf32>
    %34 = tpu.matmul %31, %33, %cst_24 {dimension_numbers = #tpu.dot_dimension_numbers<[1], [0], [0], [1], [0, 0, 1, 1], [], []>} : vector<64x128xbf16>, vector<128x128xbf16>, vector<64x128xf32> -> vector<64x128xf32>
    %c3_25 = arith.constant 3 : index
    %c0_26 = arith.constant 0 : index
    %c0_27 = arith.constant 0 : index
    %35 = vector.load %arg3[%c3_25, %c0_26, %c0_27] : memref<8x1x128xf32, #tpu.memory_space<vmem>>, vector<1x1x128xf32>
    %36 = vector.shape_cast %35 : vector<1x1x128xf32> to vector<1x128xf32>
    %37 = vector.broadcast %36 : vector<1x128xf32> to vector<64x128xf32>
    %38 = arith.addf %34, %37 : vector<64x128xf32>
    %39 = arith.truncf %38 : vector<64x128xf32> to vector<64x128xbf16>
    %c4 = arith.constant 4 : index
    %c0_28 = arith.constant 0 : index
    %c0_29 = arith.constant 0 : index
    %40 = vector.load %arg2[%c4, %c0_28, %c0_29] : memref<8x128x128xbf16, #tpu.memory_space<vmem>>, vector<1x128x128xbf16>
    %41 = vector.shape_cast %40 : vector<1x128x128xbf16> to vector<128x128xbf16>
    %cst_30 = arith.constant dense<0.000000e+00> : vector<64x128xf32>
    %42 = tpu.matmul %39, %41, %cst_30 {dimension_numbers = #tpu.dot_dimension_numbers<[1], [0], [0], [1], [0, 0, 1, 1], [], []>} : vector<64x128xbf16>, vector<128x128xbf16>, vector<64x128xf32> -> vector<64x128xf32>
    %c4_31 = arith.constant 4 : index
    %c0_32 = arith.constant 0 : index
    %c0_33 = arith.constant 0 : index
    %43 = vector.load %arg3[%c4_31, %c0_32, %c0_33] : memref<8x1x128xf32, #tpu.memory_space<vmem>>, vector<1x1x128xf32>
    %44 = vector.shape_cast %43 : vector<1x1x128xf32> to vector<1x128xf32>
    %45 = vector.broadcast %44 : vector<1x128xf32> to vector<64x128xf32>
    %46 = arith.addf %42, %45 : vector<64x128xf32>
    %cst_34 = arith.constant 0.000000e+00 : f32
    %47 = vector.broadcast %cst_34 : f32 to vector<64x128xf32>
    %48 = arith.maximumf %46, %47 : vector<64x128xf32>
    %49 = arith.truncf %48 : vector<64x128xf32> to vector<64x128xbf16>
    %c5 = arith.constant 5 : index
    %c0_35 = arith.constant 0 : index
    %c0_36 = arith.constant 0 : index
    %50 = vector.load %arg2[%c5, %c0_35, %c0_36] : memref<8x128x128xbf16, #tpu.memory_space<vmem>>, vector<1x128x128xbf16>
    %51 = vector.shape_cast %50 : vector<1x128x128xbf16> to vector<128x128xbf16>
    %cst_37 = arith.constant dense<0.000000e+00> : vector<64x128xf32>
    %52 = tpu.matmul %49, %51, %cst_37 {dimension_numbers = #tpu.dot_dimension_numbers<[1], [0], [0], [1], [0, 0, 1, 1], [], []>} : vector<64x128xbf16>, vector<128x128xbf16>, vector<64x128xf32> -> vector<64x128xf32>
    %c5_38 = arith.constant 5 : index
    %c0_39 = arith.constant 0 : index
    %c0_40 = arith.constant 0 : index
    %53 = vector.load %arg3[%c5_38, %c0_39, %c0_40] : memref<8x1x128xf32, #tpu.memory_space<vmem>>, vector<1x1x128xf32>
    %54 = vector.shape_cast %53 : vector<1x1x128xf32> to vector<1x128xf32>
    %55 = vector.broadcast %54 : vector<1x128xf32> to vector<64x128xf32>
    %56 = arith.addf %52, %55 : vector<64x128xf32>
    %cst_41 = arith.constant 0.000000e+00 : f32
    %57 = vector.broadcast %cst_41 : f32 to vector<64x128xf32>
    %58 = arith.maximumf %56, %57 : vector<64x128xf32>
    %59 = arith.truncf %58 : vector<64x128xf32> to vector<64x128xbf16>
    %c6 = arith.constant 6 : index
    %c0_42 = arith.constant 0 : index
    %c0_43 = arith.constant 0 : index
    %60 = vector.load %arg2[%c6, %c0_42, %c0_43] : memref<8x128x128xbf16, #tpu.memory_space<vmem>>, vector<1x128x128xbf16>
    %61 = vector.shape_cast %60 : vector<1x128x128xbf16> to vector<128x128xbf16>
    %cst_44 = arith.constant dense<0.000000e+00> : vector<64x128xf32>
    %62 = tpu.matmul %59, %61, %cst_44 {dimension_numbers = #tpu.dot_dimension_numbers<[1], [0], [0], [1], [0, 0, 1, 1], [], []>} : vector<64x128xbf16>, vector<128x128xbf16>, vector<64x128xf32> -> vector<64x128xf32>
    %c6_45 = arith.constant 6 : index
    %c0_46 = arith.constant 0 : index
    %c0_47 = arith.constant 0 : index
    %63 = vector.load %arg3[%c6_45, %c0_46, %c0_47] : memref<8x1x128xf32, #tpu.memory_space<vmem>>, vector<1x1x128xf32>
    %64 = vector.shape_cast %63 : vector<1x1x128xf32> to vector<1x128xf32>
    %65 = vector.broadcast %64 : vector<1x128xf32> to vector<64x128xf32>
    %66 = arith.addf %62, %65 : vector<64x128xf32>
    %cst_48 = arith.constant 0.000000e+00 : f32
    %67 = vector.broadcast %cst_48 : f32 to vector<64x128xf32>
    %68 = arith.maximumf %66, %67 : vector<64x128xf32>
    %69 = arith.truncf %68 : vector<64x128xf32> to vector<64x128xbf16>
    %c7 = arith.constant 7 : index
    %c0_49 = arith.constant 0 : index
    %c0_50 = arith.constant 0 : index
    %70 = vector.load %arg2[%c7, %c0_49, %c0_50] : memref<8x128x128xbf16, #tpu.memory_space<vmem>>, vector<1x128x128xbf16>
    %71 = vector.shape_cast %70 : vector<1x128x128xbf16> to vector<128x128xbf16>
    %cst_51 = arith.constant dense<0.000000e+00> : vector<64x128xf32>
    %72 = tpu.matmul %69, %71, %cst_51 {dimension_numbers = #tpu.dot_dimension_numbers<[1], [0], [0], [1], [0, 0, 1, 1], [], []>} : vector<64x128xbf16>, vector<128x128xbf16>, vector<64x128xf32> -> vector<64x128xf32>
    %c7_52 = arith.constant 7 : index
    %c0_53 = arith.constant 0 : index
    %c0_54 = arith.constant 0 : index
    %73 = vector.load %arg3[%c7_52, %c0_53, %c0_54] : memref<8x1x128xf32, #tpu.memory_space<vmem>>, vector<1x1x128xf32>
    %74 = vector.shape_cast %73 : vector<1x1x128xf32> to vector<1x128xf32>
    %75 = vector.broadcast %74 : vector<1x128xf32> to vector<64x128xf32>
    %76 = arith.addf %72, %75 : vector<64x128xf32>
    %c0_55 = arith.constant 0 : index
    %c0_56 = arith.constant 0 : index
    %77 = vector.load %arg4[%c0_55, %c0_56] : memref<64x128xf32, #tpu.memory_space<vmem>>, vector<64x128xf32>
    tpu.vector_store %arg4[%c0_55, %c0_56], %76 {strides = array<i32>} : memref<64x128xf32, #tpu.memory_space<vmem>>, vector<64x128xf32>,
    return
  }
  func.func @transform_0(%arg0: i32) -> (i32, i32) {
    %c0_i32 = arith.constant 0 : i32
    %c0_i32_0 = arith.constant 0 : i32
    return %arg0, %c0_i32 : i32, i32
  }
  func.func @transform_1(%arg0: i32) -> (i32, i32, i32) {
    %c0_i32 = arith.constant 0 : i32
    %c0_i32_0 = arith.constant 0 : i32
    %c0_i32_1 = arith.constant 0 : i32
    %c0_i32_2 = arith.constant 0 : i32
    return %c0_i32, %c0_i32_0, %c0_i32_1 : i32, i32, i32
  }
  func.func @transform_2(%arg0: i32) -> (i32, i32, i32) {
    %c0_i32 = arith.constant 0 : i32
    %c0_i32_0 = arith.constant 0 : i32
    %c0_i32_1 = arith.constant 0 : i32
    %c0_i32_2 = arith.constant 0 : i32
    return %c0_i32, %c0_i32_0, %c0_i32_1 : i32, i32, i32
  }
  func.func @transform_3(%arg0: i32) -> (i32, i32) {
    %c0_i32 = arith.constant 0 : i32
    %c0_i32_0 = arith.constant 0 : i32
    return %arg0, %c0_i32 : i32, i32
  }
}

</mosaic_0001>

<bundles_post_ra>
// kernel: tpu_custom_call.1
= control target key start
LH: loop header
LB: loop body
LE: loop exit
PB: predicated region body
PF: predicated region fallthrough
CT: control target
= control target key end

     0   :  { %8 = vsyncpa [#allocation3], 0  ;;  %s1841_s0 = inlined_call_operand.hbm [shape: f32[64,128], index: 0, kind: input, shape index: {}]   ;;  %s1842_s1 = inlined_call_operand.hbm [shape: bf16[8,128,128], index: 1, kind: input, shape index: {}]   ;;  %s1843_s2 = inlined_call_operand.hbm [shape: f32[8,1,128], index: 2, kind: input, shape index: {}]   ;;  %s1844_s3 = inlined_call_operand.hbm [shape: f32[64,128], index: 3, kind: output, shape index: {}]  }
   0x1   :  { %9 = vsyncpa [#allocation6], 0 }
   0x2   :  { %10 = vsyncpa [#allocation4], 0  ;;  %s1793_s12 = smov [#allocation5]  }
   0x3   :  { %s28_s13 = sshll.u32 %s1793_s12, 4  ;;  %s29_s13 = int_to_ptr.vmem [resolvable:$true] %s28_s13 }
   0x4   :  { %s1715_s14 = scalar_lea.vmem %s29_s13, 8192  ;;  %p1720_p1 = scmp.lt.s32.totalorder %s29_s13, %s29_s13 }
   0x5   :  { %p1716_p0 = scmp.ne.s32.totalorder %s29_s13, %s1715_s14  ;;  %p1721_p2 = scmp.lt.s32.totalorder %s1715_s14, %s1715_s14 }
   0x7   :  { %p1722_p3 = por %p1721_p2, %p1720_p1 }
   0x9   :  { %p1723_p4 = pnand %p1722_p3, %p1716_p0 }
   0xb   :  { %1726 = shalt.err (!%p1723_p4)
}
   0xc   :  { %s1794_s15 = smov 64   ;;  %s1795_s16 = smov 4  }
   0xd   :  { %34 = dma.hbm_to_vmem [thread:$0]  %s1842_s1, 8192, %s29_s13, [#allocation6], %s1794_s15, %s1794_s15, %s1795_s16  }
   0xe   :  { %s1796_s19 = smov [#allocation2]  }
   0xf   :  { %s16_s20 = sshll.u32 %s1796_s19, 4  ;;  %s17_s20 = int_to_ptr.vmem [resolvable:$true] %s16_s20 }
  0x10   :  { %s1735_s21 = scalar_lea.vmem %s17_s20, 1024  ;;  %p1740_p6 = scmp.lt.s32.totalorder %s17_s20, %s17_s20 }
  0x11   :  { %p1736_p5 = scmp.ne.s32.totalorder %s17_s20, %s1735_s21  ;;  %p1741_p7 = scmp.lt.s32.totalorder %s1735_s21, %s1735_s21 }
  0x13   :  { %p1742_p8 = por %p1741_p7, %p1740_p6 }
  0x15   :  { %p1743_p9 = pnand %p1742_p8, %p1736_p5 }
  0x17   :  { %1746 = shalt.err (!%p1743_p9)
}
  0x18   :  { %s1797_s22 = smov 128   ;;  %s1798_s23 = smov 8  }
  0x19   :  { %22 = dma.hbm_to_vmem [thread:$0]  %s1841_s0, 1024, %s17_s20, [#allocation3], %s1797_s22, %s1797_s22, %s1798_s23  }
  0x1a   :  { %s1799_s1 = smov [#allocation7]  }
  0x1b   :  { %s40_s26 = sshll.u32 %s1799_s1, 4  ;;  %s41_s26 = int_to_ptr.vmem [resolvable:$true] %s40_s26 }
  0x1c   :  { %s1755_s27 = scalar_lea.vmem %s41_s26, 128  ;;  %p1760_p11 = scmp.lt.s32.totalorder %s41_s26, %s41_s26 }
  0x1d   :  { %p1756_p10 = scmp.ne.s32.totalorder %s41_s26, %s1755_s27  ;;  %p1761_p12 = scmp.lt.s32.totalorder %s1755_s27, %s1755_s27 }
  0x1f   :  { %p1762_p13 = por %p1761_p12, %p1760_p11 }
  0x21   :  { %p1763_p0 = pnand %p1762_p13, %p1756_p10 }
  0x23   :  { %1766 = shalt.err (!%p1763_p0)
}
  0x24   :  { %s1800_s28 = smov 16   ;;  %s1801_s29 = smov 1  }
  0x25   :  { %46 = dma.hbm_to_vmem [thread:$0]  %s1843_s2, 128, %s41_s26, [#allocation6], %s1800_s28, %s1800_s28, %s1801_s29  }
  0x26   :  { %1787 = dma.done.wait [#allocation3], 1024  }
  0x27   :  { %1788 = vsyncadd [#allocation3], 4294966272 }
  0x28   :  { %1789 = dma.done.wait [#allocation6], 8320  }
  0x29   :  { %1790 = vsyncadd [#allocation6], 4294958976  ;;  %v1643_v0 = vld [vmem:[#allocation5 + $0x38] sm:$0xff]   ;;  %v1644_v1 = vld [vmem:[#allocation5 + $0x30] sm:$0xff]   ;;  %s1802_s0 = smov [#allocation8]  }
  0x2a   :  { %1441 = vmatprep.subr.bf16.mxu0 %v1643_v0  ;;  %v1645_v2 = vld [vmem:[#allocation5 + $0x28] sm:$0xff]   ;;  %v1646_v3 = vld [vmem:[#allocation5 + $0x20] sm:$0xff]   ;;  %v1647_v7 = vld [vmem:[#allocation5 + $0x18] sm:$0xff]   ;;  %s1260_s2 = sshll.u32 %s1802_s0, 4  ;;  %s1261_s2 = int_to_ptr.vmem [resolvable:$true] %s1260_s2 }
  0x2b   :  { %1442 = vmatpush3.bf16.msra.mxu0 %v1643_v0  ;;  %v57_v4 = vld [vmem:[#allocation2] sm:$0xff]  ;;  %v58_v5 = vld [vmem:[#allocation2 + $0x8] sm:$0xff]  ;;  %v1651_v8 = vld [vmem:[#allocation5 + $0x78] sm:$0xff]   ;;  %s1767_s5 = scalar_lea.vmem %s1261_s2, 1024  ;;  %p1772_p2 = scmp.lt.s32.totalorder %s1261_s2, %s1261_s2 }
  0x2c   :  { %1443 = vmatprep.subr.bf16.mxu0 %v1644_v1  ;;  %v65_v6 = vpack.c.bf16 %v58_v5, %v57_v4  ;;  %v1652_v9 = vld [vmem:[#allocation5 + $0x70] sm:$0xff]   ;;  %1465 = vmatprep.subr.bf16.mxu1 %v1651_v8  ;;  %v1653_v11 = vld [vmem:[#allocation5 + $0x68] sm:$0xff]   ;;  %v1654_v12 = vld [vmem:[#allocation5 + $0x60] sm:$0xff]   ;;  %p1768_p1 = scmp.ne.s32.totalorder %s1261_s2, %s1767_s5  ;;  %p1773_p3 = scmp.lt.s32.totalorder %s1767_s5, %s1767_s5 }
  0x2d   :  { %v1648_v10 = vld [vmem:[#allocation5 + $0x10] sm:$0xff]   ;;  %1466 = vmatpush3.bf16.msra.mxu1 %v1651_v8  ;;  %v1649_v13 = vld [vmem:[#allocation5 + $0x8] sm:$0xff]   ;;  %v1655_v14 = vld [vmem:[#allocation5 + $0x58] sm:$0xff]  }
  0x2e   :  { %1457 = vmatprep.mubr.bf16.mxu0 %v65_v6  ;;  %1467 = vmatprep.subr.bf16.mxu1 %v1652_v9  ;;  %v1650_v15 = vld [vmem:[#allocation5] sm:$0xff]   ;;  %v59_v16 = vld [vmem:[#allocation2 + $0x10] sm:$0xff]  ;;  %v60_v17 = vld [vmem:[#allocation2 + $0x18] sm:$0xff]  ;;  %p1774_p4 = por %p1773_p3, %p1772_p2 }
  0x2f   :  { %1444 = vmatpush3.bf16.msra.mxu0 %v1644_v1  ;;  %v61_v18 = vld [vmem:[#allocation2 + $0x20] sm:$0xff]  ;;  %v62_v19 = vld [vmem:[#allocation2 + $0x28] sm:$0xff]  ;;  %v66_v20 = vpack.c.bf16 %v60_v17, %v59_v16  ;;  %v63_v22 = vld [vmem:[#allocation2 + $0x30] sm:$0xff] }
  0x30   :  { %1445 = vmatprep.subr.bf16.mxu0 %v1645_v2  ;;  %v67_v21 = vpack.c.bf16 %v62_v19, %v61_v18  ;;  %v64_v23 = vld [vmem:[#allocation2 + $0x38] sm:$0xff]  ;;  %v1656_v25 = vld [vmem:[#allocation5 + $0x50] sm:$0xff]   ;;  %v1657_v26 = vld [vmem:[#allocation5 + $0x48] sm:$0xff]   ;;  %p1775_p5 = pnand %p1774_p4, %p1768_p1 }
  0x31   :  { %1468 = vmatpush3.bf16.msra.mxu1 %v1652_v9  ;;  %v68_v24 = vpack.c.bf16 %v64_v23, %v63_v22  ;;  %v1658_v27 = vld [vmem:[#allocation5 + $0x40] sm:$0xff]   ;;  %v1659_v28 = vld [vmem:[#allocation5 + $0xb8] sm:$0xff]   ;;  %v1660_v29 = vld [vmem:[#allocation5 + $0xb0] sm:$0xff]  }
  0x32   :  { %1469 = vmatprep.subr.bf16.mxu1 %v1653_v11  ;;  %v1661_v30 = vld [vmem:[#allocation5 + $0xa8] sm:$0xff]   ;;  %v1662_v31 = vld [vmem:[#allocation5 + $0xa0] sm:$0xff]   ;;  %v1663_v32 = vld [vmem:[#allocation5 + $0x98] sm:$0xff]  }
  0x33   :  { %1446 = vmatpush3.bf16.msra.mxu0 %v1645_v2  ;;  %v1273_v35 = vld [vmem:[#allocation7] ss:$0 sm:$0xff]  ;;  %v1664_v62 = vld [vmem:[#allocation5 + $0x90] sm:$0xff]   ;;  %v1665_v63 = vld [vmem:[#allocation5 + $0x88] sm:$0xff]  }
  0x34   :  { %1447 = vmatprep.subr.bf16.mxu0 %v1646_v3  ;;  %v1666_v0 = vld [vmem:[#allocation5 + $0x80] sm:$0xff]   ;;  %v1667_v1 = vld [vmem:[#allocation5 + $0xf8] sm:$0xff]   ;;  %v1668_v2 = vld [vmem:[#allocation5 + $0xf0] sm:$0xff]  }
  0x35   :  { %1470 = vmatpush3.bf16.msra.mxu1 %v1653_v11  ;;  %v1670_v4 = vld [vmem:[#allocation5 + $0xe0] sm:$0xff]   ;;  %v1671_v5 = vld [vmem:[#allocation5 + $0xd8] sm:$0xff]  }
  0x36   :  { %1471 = vmatprep.subr.bf16.mxu1 %v1654_v12  ;;  %v1282_v8 = vld [vmem:[#allocation7 + $0x1] ss:$0 sm:$0xff] }
  0x37   :  { %1448 = vmatpush3.bf16.msra.mxu0 %v1646_v3  ;;  %v1669_v3 = vld [vmem:[#allocation5 + $0xe8] sm:$0xff]  }
  0x38   :  { %1449 = vmatprep.subr.bf16.mxu0 %v1647_v7 }
  0x39   :  { %1472 = vmatpush3.bf16.msra.mxu1 %v1654_v12 }
  0x3a   :  { %1473 = vmatprep.subr.bf16.mxu1 %v1655_v14 }
  0x3b   :  { %1450 = vmatpush3.bf16.msra.mxu0 %v1647_v7 }
  0x3c   :  { %1451 = vmatprep.subr.bf16.mxu0 %v1648_v10 }
  0x3d   :  { %1474 = vmatpush3.bf16.msra.mxu1 %v1655_v14 }
  0x3e   :  { %1475 = vmatprep.subr.bf16.mxu1 %v1656_v25 }
  0x3f   :  { %1452 = vmatpush3.bf16.msra.mxu0 %v1648_v10 }
  0x40   :  { %1453 = vmatprep.subr.bf16.mxu0 %v1649_v13 }
  0x41   :  { %1476 = vmatpush3.bf16.msra.mxu1 %v1656_v25 }
  0x42   :  { %1477 = vmatprep.subr.bf16.mxu1 %v1657_v26 }
  0x43   :  { %1454 = vmatpush3.bf16.msra.mxu0 %v1649_v13 }
  0x44   :  { %1455 = vmatprep.subr.bf16.mxu0 %v1650_v15 }
  0x45   :  { %1478 = vmatpush3.bf16.msra.mxu1 %v1657_v26 }
  0x46   :  { %1479 = vmatprep.subr.bf16.mxu1 %v1658_v27 }
  0x47   :  { %1456 = vmatpush3.bf16.msra.mxu0 %v1650_v15 }
  0x48   :  { %1489 = vmatprep.subr.bf16.mxu0 %v1659_v28 }
  0x49   :  { %1480 = vmatpush3.bf16.msra.mxu1 %v1658_v27 }
  0x4a   :  { %1458 = vmatmul.mubr.bf16.vlgmr.msra.gmra.mxu0 %v66_v20  ;;  %1513 = vmatprep.subr.bf16.mxu1 %v1667_v1 }
  0x4b   :  { %1461 = vmatprep.mubr.bf16.mxu0 %v67_v21  ;;  %1490 = vmatpush3.bf16.msra.mxu0 %v1659_v28 }
  0x4c   :  { %1491 = vmatprep.subr.bf16.mxu0 %v1660_v29 }
  0x4f   :  { %1492 = vmatpush3.bf16.msra.mxu0 %v1660_v29 }
  0x50   :  { %1493 = vmatprep.subr.bf16.mxu0 %v1661_v30 }
  0x52   :  { %1462 = vmatmul.mubr.bf16.gmra.mxu0 %v68_v24 }
  0x53   :  { %1494 = vmatpush3.bf16.msra.mxu0 %v1661_v30 }
  0x54   :  { %1495 = vmatprep.subr.bf16.mxu0 %v1662_v31 }
  0x57   :  { %1496 = vmatpush3.bf16.msra.mxu0 %v1662_v31 }
  0x58   :  { %1497 = vmatprep.subr.bf16.mxu0 %v1663_v32 }
  0x5b   :  { %1498 = vmatpush3.bf16.msra.mxu0 %v1663_v32 }
  0x5c   :  { %1499 = vmatprep.subr.bf16.mxu0 %v1664_v62 }
  0x5f   :  { %1500 = vmatpush3.bf16.msra.mxu0 %v1664_v62 }
  0x60   :  { %1501 = vmatprep.subr.bf16.mxu0 %v1665_v63 }
  0x63   :  { %1502 = vmatpush3.bf16.msra.mxu0 %v1665_v63 }
  0x64   :  { %1503 = vmatprep.subr.bf16.mxu0 %v1666_v0 }
  0x67   :  { %1504 = vmatpush3.bf16.msra.mxu0 %v1666_v0 }
 0x10a   :  { %v1459_v33 = vpop.f32.mrf.mxu0 }
 0x10b   :  { %v183_v39 = vadd.f32 %v1459_v33, %v1273_v35 }
 0x10c   :  { %v174_v34 = vpop.f32.mrf.mxu0 }
 0x10d   :  { %v175_v37 = vadd.f32 %v1273_v35, %v174_v34  ;;  %v207_v46 = vmax.f32 %v183_v39, 0.0  ;;  %v1676_v39 = vld [vmem:[#allocation5 + $0x130] sm:$0xff]  }
 0x10e   :  { %v1460_v36 = vpop.f32.mrf.mxu0 }
 0x10f   :  { %v186_v38 = vadd.f32 %v1460_v36, %v1273_v35  ;;  %v205_v44 = vmax.f32 %v175_v37, 0.0  ;;  %v1673_v36 = vld [vmem:[#allocation5 + $0xc8] sm:$0xff]   ;;  %v1674_v37 = vld [vmem:[#allocation5 + $0xc0] sm:$0xff]  }
 0x110   :  { %v177_v40 = vpop.f32.mrf.mxu0 }
 0x111   :  { %v178_v41 = vadd.f32 %v1273_v35, %v177_v40  ;;  %v208_v42 = vmax.f32 %v186_v38, 0.0  ;;  %v1675_v38 = vld [vmem:[#allocation5 + $0x138] sm:$0xff]   ;;  %v1677_v40 = vld [vmem:[#allocation5 + $0x128] sm:$0xff]  }
 0x112   :  { %v1463_v43 = vpop.f32.mrf.mxu0  ;;  %1537 = vmatprep.subr.bf16.mxu0 %v1675_v38 }
 0x113   :  { %v206_v45 = vmax.f32 %v178_v41, 0.0  ;;  %v214_v49 = vpack.c.bf16 %v208_v42, %v207_v46  ;;  %v199_v53 = vadd.f32 %v1463_v43, %v1273_v35  ;;  %v1678_v41 = vld [vmem:[#allocation5 + $0x120] sm:$0xff]   ;;  %v1679_v42 = vld [vmem:[#allocation5 + $0x118] sm:$0xff]  }
 0x114   :  { %v190_v47 = vpop.f32.mrf.mxu0 }
 0x115   :  { %v213_v48 = vpack.c.bf16 %v206_v45, %v205_v44  ;;  %v191_v51 = vadd.f32 %v1273_v35, %v190_v47  ;;  %v211_v59 = vmax.f32 %v199_v53, 0.0  ;;  %v1291_v45 = vld [vmem:[#allocation7 + $0x2] ss:$0 sm:$0xff] }
 0x116   :  { %v1464_v50 = vpop.f32.mrf.mxu0 }
 0x117   :  { %v202_v52 = vadd.f32 %v1464_v50, %v1273_v35  ;;  %1481 = vmatprep.mubr.bf16.mxu1 %v213_v48  ;;  %v209_v57 = vmax.f32 %v191_v51, 0.0 }
 0x118   :  { %v193_v54 = vpop.f32.mrf.mxu0  ;;  %1482 = vmatmul.mubr.bf16.vlgmr.msra.gmra.mxu1 %v214_v49 }
 0x119   :  { %v194_v55 = vadd.f32 %v1273_v35, %v193_v54  ;;  %v212_v56 = vmax.f32 %v202_v52, 0.0  ;;  %1514 = vmatpush3.bf16.msra.mxu1 %v1667_v1  ;;  %v1672_v35 = vld [vmem:[#allocation5 + $0xd0] sm:$0xff]  }
 0x11a   :  { %1515 = vmatprep.subr.bf16.mxu1 %v1668_v2 }
 0x11b   :  { %v210_v58 = vmax.f32 %v194_v55, 0.0  ;;  %v216_v61 = vpack.c.bf16 %v212_v56, %v211_v59 }
 0x11d   :  { %v215_v60 = vpack.c.bf16 %v210_v58, %v209_v57  ;;  %1516 = vmatpush3.bf16.msra.mxu1 %v1668_v2 }
 0x11e   :  { %1517 = vmatprep.subr.bf16.mxu1 %v1669_v3 }
 0x11f   :  { %1485 = vmatprep.mubr.bf16.mxu1 %v215_v60 }
 0x120   :  { %1486 = vmatmul.mubr.bf16.gmra.mxu1 %v216_v61 }
 0x121   :  { %1518 = vmatpush3.bf16.msra.mxu1 %v1669_v3 }
 0x122   :  { %1519 = vmatprep.subr.bf16.mxu1 %v1670_v4 }
 0x125   :  { %1520 = vmatpush3.bf16.msra.mxu1 %v1670_v4 }
 0x126   :  { %1521 = vmatprep.subr.bf16.mxu1 %v1671_v5 }
 0x129   :  { %1522 = vmatpush3.bf16.msra.mxu1 %v1671_v5 }
 0x12a   :  { %1523 = vmatprep.subr.bf16.mxu1 %v1672_v35 }
 0x12d   :  { %1524 = vmatpush3.bf16.msra.mxu1 %v1672_v35 }
 0x12e   :  { %1525 = vmatprep.subr.bf16.mxu1 %v1673_v36 }
 0x131   :  { %1526 = vmatpush3.bf16.msra.mxu1 %v1673_v36 }
 0x132   :  { %1527 = vmatprep.subr.bf16.mxu1 %v1674_v37 }
 0x135   :  { %1528 = vmatpush3.bf16.msra.mxu1 %v1674_v37  ;;  %v1688_v37 = vld [vmem:[#allocation5 + $0x150] sm:$0xff]  }
 0x1d8   :  { %v1483_v6 = vpop.f32.mrf.mxu1 }
 0x1d9   :  { %v333_v12 = vadd.f32 %v1483_v6, %v1282_v8 }
 0x1da   :  { %v324_v7 = vpop.f32.mrf.mxu1 }
 0x1db   :  { %v325_v10 = vadd.f32 %v1282_v8, %v324_v7  ;;  %v357_v19 = vmax.f32 %v333_v12, 0.0  ;;  %v1684_v12 = vld [vmem:[#allocation5 + $0x170] sm:$0xff]  }
 0x1dc   :  { %v1484_v9 = vpop.f32.mrf.mxu1 }
 0x1dd   :  { %v336_v11 = vadd.f32 %v1484_v9, %v1282_v8  ;;  %v355_v17 = vmax.f32 %v325_v10, 0.0  ;;  %v1681_v9 = vld [vmem:[#allocation5 + $0x108] sm:$0xff]   ;;  %v1682_v10 = vld [vmem:[#allocation5 + $0x100] sm:$0xff]  }
 0x1de   :  { %v327_v13 = vpop.f32.mrf.mxu1 }
 0x1df   :  { %v328_v14 = vadd.f32 %v1282_v8, %v327_v13  ;;  %v358_v15 = vmax.f32 %v336_v11, 0.0  ;;  %v1683_v11 = vld [vmem:[#allocation5 + $0x178] sm:$0xff]   ;;  %v1685_v13 = vld [vmem:[#allocation5 + $0x168] sm:$0xff]  }
 0x1e0   :  { %v1487_v16 = vpop.f32.mrf.mxu1  ;;  %1561 = vmatprep.subr.bf16.mxu1 %v1683_v11 }
 0x1e1   :  { %v356_v18 = vmax.f32 %v328_v14, 0.0  ;;  %v364_v22 = vpack.c.bf16 %v358_v15, %v357_v19  ;;  %v349_v26 = vadd.f32 %v1487_v16, %v1282_v8  ;;  %v1686_v14 = vld [vmem:[#allocation5 + $0x160] sm:$0xff]   ;;  %v1687_v15 = vld [vmem:[#allocation5 + $0x158] sm:$0xff]  }
 0x1e2   :  { %v340_v20 = vpop.f32.mrf.mxu1  ;;  %v1300_v19 = vld [vmem:[#allocation7 + $0x3] ss:$0 sm:$0xff] }
 0x1e3   :  { %v363_v21 = vpack.c.bf16 %v356_v18, %v355_v17  ;;  %v341_v24 = vadd.f32 %v1282_v8, %v340_v20  ;;  %v361_v32 = vmax.f32 %v349_v26, 0.0 }
 0x1e4   :  { %v1488_v23 = vpop.f32.mrf.mxu1 }
 0x1e5   :  { %v352_v25 = vadd.f32 %v1488_v23, %v1282_v8  ;;  %1505 = vmatprep.mubr.bf16.mxu0 %v363_v21  ;;  %v359_v30 = vmax.f32 %v341_v24, 0.0 }
 0x1e6   :  { %v343_v27 = vpop.f32.mrf.mxu1  ;;  %1506 = vmatmul.mubr.bf16.vlgmr.msra.gmra.mxu0 %v364_v22 }
 0x1e7   :  { %v344_v28 = vadd.f32 %v1282_v8, %v343_v27  ;;  %v362_v29 = vmax.f32 %v352_v25, 0.0  ;;  %1538 = vmatpush3.bf16.msra.mxu0 %v1675_v38  ;;  %v1680_v8 = vld [vmem:[#allocation5 + $0x110] sm:$0xff]   ;;  %v1689_v38 = vld [vmem:[#allocation5 + $0x148] sm:$0xff]  }
 0x1e8   :  { %1539 = vmatprep.subr.bf16.mxu0 %v1676_v39 }
 0x1e9   :  { %v360_v31 = vmax.f32 %v344_v28, 0.0  ;;  %v366_v34 = vpack.c.bf16 %v362_v29, %v361_v32 }
 0x1eb   :  { %v365_v33 = vpack.c.bf16 %v360_v31, %v359_v30  ;;  %1540 = vmatpush3.bf16.msra.mxu0 %v1676_v39  ;;  %v1690_v39 = vld [vmem:[#allocation5 + $0x140] sm:$0xff]  }
 0x1ec   :  { %1541 = vmatprep.subr.bf16.mxu0 %v1677_v40 }
 0x1ed   :  { %1509 = vmatprep.mubr.bf16.mxu0 %v365_v33 }
 0x1ee   :  { %1510 = vmatmul.mubr.bf16.gmra.mxu0 %v366_v34 }
 0x1ef   :  { %1542 = vmatpush3.bf16.msra.mxu0 %v1677_v40  ;;  %v1691_v40 = vld [vmem:[#allocation5 + $0x1b8] sm:$0xff]  }
 0x1f0   :  { %1543 = vmatprep.subr.bf16.mxu0 %v1678_v41 }
 0x1f3   :  { %1544 = vmatpush3.bf16.msra.mxu0 %v1678_v41  ;;  %v1692_v41 = vld [vmem:[#allocation5 + $0x1b0] sm:$0xff]  }
 0x1f4   :  { %1545 = vmatprep.subr.bf16.mxu0 %v1679_v42 }
 0x1f7   :  { %1546 = vmatpush3.bf16.msra.mxu0 %v1679_v42  ;;  %v1693_v42 = vld [vmem:[#allocation5 + $0x1a8] sm:$0xff]  }
 0x1f8   :  { %1547 = vmatprep.subr.bf16.mxu0 %v1680_v8 }
 0x1fb   :  { %1548 = vmatpush3.bf16.msra.mxu0 %v1680_v8 }
 0x1fc   :  { %1549 = vmatprep.subr.bf16.mxu0 %v1681_v9 }
 0x1ff   :  { %1550 = vmatpush3.bf16.msra.mxu0 %v1681_v9 }
 0x200   :  { %1551 = vmatprep.subr.bf16.mxu0 %v1682_v10 }
 0x203   :  { %1552 = vmatpush3.bf16.msra.mxu0 %v1682_v10  ;;  %v1696_v10 = vld [vmem:[#allocation5 + $0x190] sm:$0xff]  }
 0x204   :  { %1585 = vmatprep.subr.bf16.mxu0 %v1691_v40 }
 0x2a6   :  { %v1507_v43 = vpop.f32.mrf.mxu0 }
 0x2a7   :  { %v483_v49 = vadd.f32 %v1507_v43, %v1291_v45  ;;  %v1694_v43 = vld [vmem:[#allocation5 + $0x1a0] sm:$0xff]  }
 0x2a8   :  { %v474_v44 = vpop.f32.mrf.mxu0 }
 0x2a9   :  { %v475_v47 = vadd.f32 %v1291_v45, %v474_v44  ;;  %v507_v56 = vmax.f32 %v483_v49, 0.0  ;;  %v1695_v44 = vld [vmem:[#allocation5 + $0x198] sm:$0xff]  }
 0x2aa   :  { %v1508_v46 = vpop.f32.mrf.mxu0 }
 0x2ab   :  { %v486_v48 = vadd.f32 %v1508_v46, %v1291_v45  ;;  %v505_v54 = vmax.f32 %v475_v47, 0.0  ;;  %v1309_v47 = vld [vmem:[#allocation7 + $0x4] ss:$0 sm:$0xff] }
 0x2ac   :  { %v477_v50 = vpop.f32.mrf.mxu0 }
 0x2ad   :  { %v478_v51 = vadd.f32 %v1291_v45, %v477_v50  ;;  %v508_v52 = vmax.f32 %v486_v48, 0.0 }
 0x2ae   :  { %v1511_v53 = vpop.f32.mrf.mxu0 }
 0x2af   :  { %v506_v55 = vmax.f32 %v478_v51, 0.0  ;;  %v514_v59 = vpack.c.bf16 %v508_v52, %v507_v56  ;;  %v499_v63 = vadd.f32 %v1511_v53, %v1291_v45 }
 0x2b0   :  { %v490_v57 = vpop.f32.mrf.mxu0 }
 0x2b1   :  { %v513_v58 = vpack.c.bf16 %v506_v55, %v505_v54  ;;  %v491_v61 = vadd.f32 %v1291_v45, %v490_v57  ;;  %v511_v5 = vmax.f32 %v499_v63, 0.0 }
 0x2b2   :  { %v1512_v60 = vpop.f32.mrf.mxu0 }
 0x2b3   :  { %v502_v62 = vadd.f32 %v1512_v60, %v1291_v45  ;;  %1529 = vmatprep.mubr.bf16.mxu1 %v513_v58  ;;  %v509_v3 = vmax.f32 %v491_v61, 0.0 }
 0x2b4   :  { %v493_v0 = vpop.f32.mrf.mxu0  ;;  %1530 = vmatmul.mubr.bf16.vlgmr.msra.gmra.mxu1 %v514_v59 }
 0x2b5   :  { %v494_v1 = vadd.f32 %v1291_v45, %v493_v0  ;;  %v512_v2 = vmax.f32 %v502_v62, 0.0  ;;  %1562 = vmatpush3.bf16.msra.mxu1 %v1683_v11  ;;  %v1697_v11 = vld [vmem:[#allocation5 + $0x188] sm:$0xff]  }
 0x2b6   :  { %1563 = vmatprep.subr.bf16.mxu1 %v1684_v12 }
 0x2b7   :  { %v510_v4 = vmax.f32 %v494_v1, 0.0  ;;  %v516_v7 = vpack.c.bf16 %v512_v2, %v511_v5 }
 0x2b9   :  { %v515_v6 = vpack.c.bf16 %v510_v4, %v509_v3  ;;  %1564 = vmatpush3.bf16.msra.mxu1 %v1684_v12  ;;  %v1698_v12 = vld [vmem:[#allocation5 + $0x180] sm:$0xff]  }
 0x2ba   :  { %1565 = vmatprep.subr.bf16.mxu1 %v1685_v13 }
 0x2bb   :  { %1533 = vmatprep.mubr.bf16.mxu1 %v515_v6 }
 0x2bc   :  { %1534 = vmatmul.mubr.bf16.gmra.mxu1 %v516_v7 }
 0x2bd   :  { %1566 = vmatpush3.bf16.msra.mxu1 %v1685_v13  ;;  %v1699_v13 = vld [vmem:[#allocation5 + $0x1f8] sm:$0xff]  }
 0x2be   :  { %1567 = vmatprep.subr.bf16.mxu1 %v1686_v14 }
 0x2c1   :  { %1568 = vmatpush3.bf16.msra.mxu1 %v1686_v14  ;;  %v1700_v14 = vld [vmem:[#allocation5 + $0x1f0] sm:$0xff]  }
 0x2c2   :  { %1569 = vmatprep.subr.bf16.mxu1 %v1687_v15 }
 0x2c5   :  { %1570 = vmatpush3.bf16.msra.mxu1 %v1687_v15  ;;  %v1701_v15 = vld [vmem:[#allocation5 + $0x1e8] sm:$0xff]  }
 0x2c6   :  { %1571 = vmatprep.subr.bf16.mxu1 %v1688_v37 }
 0x2c9   :  { %1572 = vmatpush3.bf16.msra.mxu1 %v1688_v37 }
 0x2ca   :  { %1573 = vmatprep.subr.bf16.mxu1 %v1689_v38 }
 0x2cd   :  { %1574 = vmatpush3.bf16.msra.mxu1 %v1689_v38 }
 0x2ce   :  { %1575 = vmatprep.subr.bf16.mxu1 %v1690_v39 }
 0x2d1   :  { %1576 = vmatpush3.bf16.msra.mxu1 %v1690_v39 }
 0x2d2   :  { %1609 = vmatprep.subr.bf16.mxu1 %v1699_v13 }
 0x374   :  { %v1531_v16 = vpop.f32.mrf.mxu1 }
 0x375   :  { %v633_v24 = vadd.f32 %v1531_v16, %v1300_v19  ;;  %v1702_v16 = vld [vmem:[#allocation5 + $0x1e0] sm:$0xff]  }
 0x376   :  { %v624_v17 = vpop.f32.mrf.mxu1 }
 0x377   :  { %v625_v22 = vadd.f32 %v1300_v19, %v624_v17  ;;  %v1703_v17 = vld [vmem:[#allocation5 + $0x1d8] sm:$0xff]  }
 0x378   :  { %v1532_v18 = vpop.f32.mrf.mxu1 }
 0x379   :  { %v636_v20 = vadd.f32 %v1532_v18, %v1300_v19 }
 0x37a   :  { %v627_v21 = vpop.f32.mrf.mxu1 }
 0x37b   :  { %v628_v23 = vadd.f32 %v1300_v19, %v627_v21  ;;  %v656_v27 = vpack.c.bf16 %v636_v20, %v633_v24  ;;  %v1318_v20 = vld [vmem:[#allocation7 + $0x5] ss:$0 sm:$0xff] }
 0x37c   :  { %v1535_v25 = vpop.f32.mrf.mxu1 }
 0x37d   :  { %v655_v26 = vpack.c.bf16 %v628_v23, %v625_v22  ;;  %v649_v34 = vadd.f32 %v1535_v25, %v1300_v19 }
 0x37e   :  { %v640_v28 = vpop.f32.mrf.mxu1 }
 0x37f   :  { %1553 = vmatprep.mubr.bf16.mxu0 %v655_v26  ;;  %v641_v32 = vadd.f32 %v1300_v19, %v640_v28 }
 0x380   :  { %v1536_v29 = vpop.f32.mrf.mxu1  ;;  %1554 = vmatmul.mubr.bf16.vlgmr.msra.gmra.mxu0 %v656_v27 }
 0x381   :  { %v652_v30 = vadd.f32 %v1536_v29, %v1300_v19  ;;  %1586 = vmatpush3.bf16.msra.mxu0 %v1691_v40 }
 0x382   :  { %v643_v31 = vpop.f32.mrf.mxu1  ;;  %1587 = vmatprep.subr.bf16.mxu0 %v1692_v41 }
 0x383   :  { %v644_v33 = vadd.f32 %v1300_v19, %v643_v31  ;;  %v658_v36 = vpack.c.bf16 %v652_v30, %v649_v34 }
 0x385   :  { %v657_v35 = vpack.c.bf16 %v644_v33, %v641_v32  ;;  %1588 = vmatpush3.bf16.msra.mxu0 %v1692_v41 }
 0x386   :  { %1589 = vmatprep.subr.bf16.mxu0 %v1693_v42 }
 0x387   :  { %1557 = vmatprep.mubr.bf16.mxu0 %v657_v35 }
 0x388   :  { %1558 = vmatmul.mubr.bf16.gmra.mxu0 %v658_v36 }
 0x389   :  { %1590 = vmatpush3.bf16.msra.mxu0 %v1693_v42 }
 0x38a   :  { %1591 = vmatprep.subr.bf16.mxu0 %v1694_v43 }
 0x38d   :  { %1592 = vmatpush3.bf16.msra.mxu0 %v1694_v43 }
 0x38e   :  { %1593 = vmatprep.subr.bf16.mxu0 %v1695_v44 }
 0x391   :  { %1594 = vmatpush3.bf16.msra.mxu0 %v1695_v44 }
 0x392   :  { %1595 = vmatprep.subr.bf16.mxu0 %v1696_v10 }
 0x395   :  { %1596 = vmatpush3.bf16.msra.mxu0 %v1696_v10 }
 0x396   :  { %1597 = vmatprep.subr.bf16.mxu0 %v1697_v11 }
 0x399   :  { %1598 = vmatpush3.bf16.msra.mxu0 %v1697_v11 }
 0x39a   :  { %1599 = vmatprep.subr.bf16.mxu0 %v1698_v12 }
 0x39d   :  { %1600 = vmatpush3.bf16.msra.mxu0 %v1698_v12 }
 0x440   :  { %v1555_v45 = vpop.f32.mrf.mxu0 }
 0x441   :  { %v775_v51 = vadd.f32 %v1555_v45, %v1309_v47 }
 0x442   :  { %v766_v46 = vpop.f32.mrf.mxu0 }
 0x443   :  { %v767_v49 = vadd.f32 %v1309_v47, %v766_v46  ;;  %v799_v58 = vmax.f32 %v775_v51, 0.0 }
 0x444   :  { %v1556_v48 = vpop.f32.mrf.mxu0 }
 0x445   :  { %v778_v50 = vadd.f32 %v1556_v48, %v1309_v47  ;;  %v797_v56 = vmax.f32 %v767_v49, 0.0  ;;  %v1705_v48 = vld [vmem:[#allocation5 + $0x1c8] sm:$0xff]   ;;  %v1706_v49 = vld [vmem:[#allocation5 + $0x1c0] sm:$0xff]  }
 0x446   :  { %v769_v52 = vpop.f32.mrf.mxu0 }
 0x447   :  { %v770_v53 = vadd.f32 %v1309_v47, %v769_v52  ;;  %v800_v54 = vmax.f32 %v778_v50, 0.0  ;;  %v1327_v52 = vld [vmem:[#allocation7 + $0x6] ss:$0 sm:$0xff] }
 0x448   :  { %v1559_v55 = vpop.f32.mrf.mxu0 }
 0x449   :  { %v798_v57 = vmax.f32 %v770_v53, 0.0  ;;  %v806_v61 = vpack.c.bf16 %v800_v54, %v799_v58  ;;  %v791_v1 = vadd.f32 %v1559_v55, %v1309_v47 }
 0x44a   :  { %v782_v59 = vpop.f32.mrf.mxu0 }
 0x44b   :  { %v805_v60 = vpack.c.bf16 %v798_v57, %v797_v56  ;;  %v783_v63 = vadd.f32 %v1309_v47, %v782_v59  ;;  %v803_v7 = vmax.f32 %v791_v1, 0.0 }
 0x44c   :  { %v1560_v62 = vpop.f32.mrf.mxu0 }
 0x44d   :  { %v794_v0 = vadd.f32 %v1560_v62, %v1309_v47  ;;  %1577 = vmatprep.mubr.bf16.mxu1 %v805_v60  ;;  %v801_v5 = vmax.f32 %v783_v63, 0.0 }
 0x44e   :  { %v785_v2 = vpop.f32.mrf.mxu0  ;;  %1578 = vmatmul.mubr.bf16.vlgmr.msra.gmra.mxu1 %v806_v61 }
 0x44f   :  { %v786_v3 = vadd.f32 %v1309_v47, %v785_v2  ;;  %v804_v4 = vmax.f32 %v794_v0, 0.0  ;;  %1610 = vmatpush3.bf16.msra.mxu1 %v1699_v13  ;;  %v1704_v47 = vld [vmem:[#allocation5 + $0x1d0] sm:$0xff]  }
 0x450   :  { %1611 = vmatprep.subr.bf16.mxu1 %v1700_v14 }
 0x451   :  { %v802_v6 = vmax.f32 %v786_v3, 0.0  ;;  %v808_v9 = vpack.c.bf16 %v804_v4, %v803_v7 }
 0x453   :  { %v807_v8 = vpack.c.bf16 %v802_v6, %v801_v5  ;;  %1612 = vmatpush3.bf16.msra.mxu1 %v1700_v14 }
 0x454   :  { %1613 = vmatprep.subr.bf16.mxu1 %v1701_v15 }
 0x455   :  { %1581 = vmatprep.mubr.bf16.mxu1 %v807_v8 }
 0x456   :  { %1582 = vmatmul.mubr.bf16.gmra.mxu1 %v808_v9 }
 0x457   :  { %1614 = vmatpush3.bf16.msra.mxu1 %v1701_v15  ;;  %v1336_v15 = vld [vmem:[#allocation7 + $0x7] ss:$0 sm:$0xff] }
 0x458   :  { %1615 = vmatprep.subr.bf16.mxu1 %v1702_v16 }
 0x45b   :  { %1616 = vmatpush3.bf16.msra.mxu1 %v1702_v16 }
 0x45c   :  { %1617 = vmatprep.subr.bf16.mxu1 %v1703_v17 }
 0x45f   :  { %1618 = vmatpush3.bf16.msra.mxu1 %v1703_v17 }
 0x460   :  { %1619 = vmatprep.subr.bf16.mxu1 %v1704_v47 }
 0x463   :  { %1620 = vmatpush3.bf16.msra.mxu1 %v1704_v47 }
 0x464   :  { %1621 = vmatprep.subr.bf16.mxu1 %v1705_v48 }
 0x467   :  { %1622 = vmatpush3.bf16.msra.mxu1 %v1705_v48 }
 0x468   :  { %1623 = vmatprep.subr.bf16.mxu1 %v1706_v49 }
 0x46b   :  { %1624 = vmatpush3.bf16.msra.mxu1 %v1706_v49 }
 0x50e   :  { %v1579_v18 = vpop.f32.mrf.mxu1 }
 0x50f   :  { %v925_v24 = vadd.f32 %v1579_v18, %v1318_v20 }
 0x510   :  { %v916_v19 = vpop.f32.mrf.mxu1 }
 0x511   :  { %v917_v22 = vadd.f32 %v1318_v20, %v916_v19  ;;  %v949_v31 = vmax.f32 %v925_v24, 0.0 }
 0x512   :  { %v1580_v21 = vpop.f32.mrf.mxu1 }
 0x513   :  { %v928_v23 = vadd.f32 %v1580_v21, %v1318_v20  ;;  %v947_v29 = vmax.f32 %v917_v22, 0.0 }
 0x514   :  { %v919_v25 = vpop.f32.mrf.mxu1 }
 0x515   :  { %v920_v26 = vadd.f32 %v1318_v20, %v919_v25  ;;  %v950_v27 = vmax.f32 %v928_v23, 0.0 }
 0x516   :  { %v1583_v28 = vpop.f32.mrf.mxu1 }
 0x517   :  { %v948_v30 = vmax.f32 %v920_v26, 0.0  ;;  %v956_v34 = vpack.c.bf16 %v950_v27, %v949_v31  ;;  %v941_v38 = vadd.f32 %v1583_v28, %v1318_v20 }
 0x518   :  { %v932_v32 = vpop.f32.mrf.mxu1 }
 0x519   :  { %v955_v33 = vpack.c.bf16 %v948_v30, %v947_v29  ;;  %v933_v36 = vadd.f32 %v1318_v20, %v932_v32  ;;  %v953_v44 = vmax.f32 %v941_v38, 0.0 }
 0x51a   :  { %v1584_v35 = vpop.f32.mrf.mxu1 }
 0x51b   :  { %v944_v37 = vadd.f32 %v1584_v35, %v1318_v20  ;;  %1601 = vmatprep.mubr.bf16.mxu0 %v955_v33  ;;  %v951_v42 = vmax.f32 %v933_v36, 0.0 }
 0x51c   :  { %v935_v39 = vpop.f32.mrf.mxu1  ;;  %1602 = vmatmul.mubr.bf16.vlgmr.msra.gmra.mxu0 %v956_v34 }
 0x51d   :  { %v936_v40 = vadd.f32 %v1318_v20, %v935_v39  ;;  %v954_v41 = vmax.f32 %v944_v37, 0.0 }
 0x51f   :  { %v952_v43 = vmax.f32 %v936_v40, 0.0  ;;  %v958_v46 = vpack.c.bf16 %v954_v41, %v953_v44 }
 0x521   :  { %v957_v45 = vpack.c.bf16 %v952_v43, %v951_v42 }
 0x523   :  { %1605 = vmatprep.mubr.bf16.mxu0 %v957_v45 }
 0x524   :  { %1606 = vmatmul.mubr.bf16.gmra.mxu0 %v958_v46 }
 0x5dc   :  { %v1603_v50 = vpop.f32.mrf.mxu0 }
 0x5dd   :  { %v1075_v56 = vadd.f32 %v1603_v50, %v1327_v52 }
 0x5de   :  { %v1066_v51 = vpop.f32.mrf.mxu0 }
 0x5df   :  { %v1067_v54 = vadd.f32 %v1327_v52, %v1066_v51  ;;  %v1099_v63 = vmax.f32 %v1075_v56, 0.0 }
 0x5e0   :  { %v1604_v53 = vpop.f32.mrf.mxu0 }
 0x5e1   :  { %v1078_v55 = vadd.f32 %v1604_v53, %v1327_v52  ;;  %v1097_v61 = vmax.f32 %v1067_v54, 0.0 }
 0x5e2   :  { %v1069_v57 = vpop.f32.mrf.mxu0 }
 0x5e3   :  { %v1070_v58 = vadd.f32 %v1327_v52, %v1069_v57  ;;  %v1100_v59 = vmax.f32 %v1078_v55, 0.0 }
 0x5e4   :  { %v1607_v60 = vpop.f32.mrf.mxu0 }
 0x5e5   :  { %v1098_v62 = vmax.f32 %v1070_v58, 0.0  ;;  %v1106_v2 = vpack.c.bf16 %v1100_v59, %v1099_v63  ;;  %v1091_v6 = vadd.f32 %v1607_v60, %v1327_v52 }
 0x5e6   :  { %v1082_v0 = vpop.f32.mrf.mxu0 }
 0x5e7   :  { %v1105_v1 = vpack.c.bf16 %v1098_v62, %v1097_v61  ;;  %v1083_v4 = vadd.f32 %v1327_v52, %v1082_v0  ;;  %v1103_v12 = vmax.f32 %v1091_v6, 0.0 }
 0x5e8   :  { %v1608_v3 = vpop.f32.mrf.mxu0 }
 0x5e9   :  { %v1094_v5 = vadd.f32 %v1608_v3, %v1327_v52  ;;  %1625 = vmatprep.mubr.bf16.mxu1 %v1105_v1  ;;  %v1101_v10 = vmax.f32 %v1083_v4, 0.0 }
 0x5ea   :  { %v1085_v7 = vpop.f32.mrf.mxu0  ;;  %1626 = vmatmul.mubr.bf16.vlgmr.msra.gmra.mxu1 %v1106_v2 }
 0x5eb   :  { %v1086_v8 = vadd.f32 %v1327_v52, %v1085_v7  ;;  %v1104_v9 = vmax.f32 %v1094_v5, 0.0 }
 0x5ed   :  { %v1102_v11 = vmax.f32 %v1086_v8, 0.0  ;;  %v1108_v14 = vpack.c.bf16 %v1104_v9, %v1103_v12 }
 0x5ef   :  { %v1107_v13 = vpack.c.bf16 %v1102_v11, %v1101_v10 }
 0x5f1   :  { %1629 = vmatprep.mubr.bf16.mxu1 %v1107_v13 }
 0x5f2   :  { %1630 = vmatmul.mubr.bf16.gmra.mxu1 %v1108_v14 }
 0x6aa   :  { %v1627_v16 = vpop.f32.mrf.mxu1 }
 0x6ab   :  { %v1225_v17 = vadd.f32 %v1627_v16, %v1336_v15 }
 0x6ac   :  { %v1216_v18 = vpop.f32.mrf.mxu1 }
 0x6ad   :  { %1249 = vst [vmem:[#allocation8 + $0x10] sm:$0xff] %v1225_v17  ;;  %v1217_v19 = vadd.f32 %v1336_v15, %v1216_v18 }
 0x6ae   :  { %v1628_v20 = vpop.f32.mrf.mxu1 }
 0x6af   :  { %1247 = vst [vmem:[#allocation8] sm:$0xff] %v1217_v19  ;;  %v1228_v21 = vadd.f32 %v1628_v20, %v1336_v15 }
 0x6b0   :  { %v1219_v22 = vpop.f32.mrf.mxu1 }
 0x6b1   :  { %1250 = vst [vmem:[#allocation8 + $0x18] sm:$0xff] %v1228_v21  ;;  %v1220_v23 = vadd.f32 %v1336_v15, %v1219_v22 }
 0x6b2   :  { %v1631_v24 = vpop.f32.mrf.mxu1 }
 0x6b3   :  { %1248 = vst [vmem:[#allocation8 + $0x8] sm:$0xff] %v1220_v23  ;;  %v1241_v25 = vadd.f32 %v1631_v24, %v1336_v15 }
 0x6b4   :  { %v1232_v26 = vpop.f32.mrf.mxu1 }
 0x6b5   :  { %1253 = vst [vmem:[#allocation8 + $0x30] sm:$0xff] %v1241_v25  ;;  %v1233_v27 = vadd.f32 %v1336_v15, %v1232_v26 }
 0x6b6   :  { %v1632_v28 = vpop.f32.mrf.mxu1 }
 0x6b7   :  { %1251 = vst [vmem:[#allocation8 + $0x20] sm:$0xff] %v1233_v27  ;;  %v1244_v29 = vadd.f32 %v1632_v28, %v1336_v15 }
 0x6b8   :  { %v1235_v30 = vpop.f32.mrf.mxu1 }
 0x6b9   :  { %1254 = vst [vmem:[#allocation8 + $0x38] sm:$0xff] %v1244_v29  ;;  %v1236_v31 = vadd.f32 %v1336_v15, %v1235_v30 }
 0x6bb   :  { %1252 = vst [vmem:[#allocation8 + $0x28] sm:$0xff] %v1236_v31 }
 0x6bc   :  { %1778 = shalt.err (!%p1775_p5)
}
 0x6bd   :  { %1266 = dma.vmem_to_hbm [thread:$0]  %s1261_s2, 1024, %s1844_s3, [#allocation4], %s1797_s22, %s1797_s22, %s1798_s23  }
 0x6be   :  { %1791 = dma.done.wait [#allocation4], 1024  }
 0x6bf   :  { %1792 = vsyncadd [#allocation4], 4294966272 }
 0x6c0   :  { %1270 = vsyncpa [#allocation3], 1 }
 0x6c1   :  { %1271 = vsyncpa [#allocation6], 1 }
 0x6c2   :  { %1272 = vsyncpa [#allocation4], 1 }

</bundles_post_ra>
